<compile_context>
chip_gen: v7x
topology: tpu7x:2x2x1
jax: 0.10.0
libtpu: 0.0.40
codegen_flags: <defaults>
</compile_context>

<pallas_src>
import math

import jax
import jax.numpy as jnp
from jax.experimental import pallas as pl
from jax.experimental.pallas import tpu as pltpu

EPS = 1e-5


def _nbytes(a):
    return math.prod(a.shape) * jnp.dtype(a.dtype).itemsize


def _head_kernel(feat_ref, wl_ref, bl_ref, fcw_ref, fcb_ref,
                 global_ref, local_ref, logits_ref):
    tn, _, h, c = feat_ref.shape                         # (TN, W, H, C)

    # mean over W (axis=1) accumulating in f32 — no full-size f32 temporary of
    # the (possibly bf16) feat block is materialized.                (TN, H, C)
    local = jnp.mean(feat_ref[...], axis=1, dtype=jnp.float32)
    # global average pool == mean over H of the per-row means        (TN, C)
    gfeat = jnp.mean(local, axis=1)
    global_ref[...] = gfeat.astype(global_ref.dtype)

    # local branch: 1x1 conv with BN2 pre-folded, computed in output
    # orientation: (TN*H, C) @ (C, out_c) -> (TN*H, out_c), then ReLU.
    # (reshape is layout-free when H % 8 == 0, true for the 8x4/8x8 re-id maps)
    wl = wl_ref[...]                                      # (C, out_c)
    y = jnp.dot(local.reshape(tn * h, c).astype(wl.dtype), wl,
                preferred_element_type=jnp.float32) + bl_ref[...]
    local_ref[...] = jnp.maximum(y, 0.0).astype(local_ref.dtype)

    # classifier on the BN1'd global feature (BN1 pre-folded into fc weights):
    # (TN, C) @ (C, num_classes_padded).
    fcw = fcw_ref[...]
    logits = jnp.dot(gfeat.astype(fcw.dtype), fcw,
                     preferred_element_type=jnp.float32) + fcb_ref[...]
    logits_ref[...] = logits.astype(logits_ref.dtype)


def fold_params(p, param_dtype=jnp.bfloat16, class_pad=128):
    """One-time constant folding: BN1 -> fc, BN2 -> local conv; pre-transpose
    to (C, out) orientation; zero-pad num_classes to a lane-dense multiple of
    128. bf16 weights by default (native MXU dtype, half the weight DMA);
    biases stay f32. Use param_dtype=jnp.float32 for bit-accurate tests.

    Returned dict's "num_classes" is a static Python int (close over the dict
    when jitting; do not pass it as a traced argument).
    """
    scale1 = p["bn1_gamma"] / jnp.sqrt(p["bn1_var"] + EPS)              # (C,)
    shift1 = p["bn1_beta"] - p["bn1_mean"] * scale1                     # (C,)
    fc_w_t = (p["fc_w"] * scale1[None, :]).T                            # (C, K)
    fc_b = p["fc_b"] + shift1 @ p["fc_w"].T                             # (K,)

    scale2 = p["bn2_gamma"] / jnp.sqrt(p["bn2_var"] + EPS)              # (out_c,)
    w_local_t = (p["w_local"] * scale2[:, None]).T                      # (C, out_c)
    b_local = scale2 * (p["b_local"] - p["bn2_mean"]) + p["bn2_beta"]   # (out_c,)

    num_classes = fc_w_t.shape[1]
    k_pad = ((num_classes + class_pad - 1) // class_pad) * class_pad
    if k_pad != num_classes:
        fc_w_t = jnp.pad(fc_w_t, ((0, 0), (0, k_pad - num_classes)))
        fc_b = jnp.pad(fc_b, (0, k_pad - num_classes))

    return {
        "w_local_t": w_local_t.astype(param_dtype),
        "b_local": b_local.reshape(1, -1).astype(jnp.float32),
        "fc_w_t": fc_w_t.astype(param_dtype),
        "fc_b": fc_b.reshape(1, -1).astype(jnp.float32),
        "num_classes": num_classes,                       # static Python int
    }


def aligned_reid_head(feat, folded, *, feat_layout="NCHW", block_n=None,
                      compute_dtype=jnp.bfloat16):
    """AlignedReID head forward.

    feat: backbone features, (N, C, H, W) if feat_layout=="NCHW", or already
      channels-last (N, W, H, C) if feat_layout=="NWHC" (preferred — skips the
      relayout copy entirely).
    Returns (global_feat [N,C], local_feat [N,H,out_c], logits [N,num_classes]),
    all f32.
    block_n: samples per grid step. Default = whole batch in one step (best on
      single-TensorCore v5e/v6e where the grid is a serial loop). On v7x pass an
      even divisor of N (e.g. N//2) so dimension_semantics=("parallel",) shards
      the grid across the 2 TensorCores and the per-core feat block fits 64 MiB.
    compute_dtype: storage dtype of the feat block (default bf16 — halves the
      dominant HBM traffic; reductions/matmuls accumulate in f32).
    """
    if feat_layout == "NCHW":
        N, C, H, W = feat.shape
        # Relayout to (N, W, H, C): C on the 128-lane axis, H on sublanes.
        # Fused with the bf16 downcast below so the extra HBM write is
        # half-size; emit NWHC from the backbone to remove it completely.
        feat = jnp.transpose(feat, (0, 3, 2, 1))
    elif feat_layout == "NWHC":
        N, W, H, C = feat.shape
    else:
        raise ValueError(f"unknown feat_layout: {feat_layout}")
    if compute_dtype is not None:
        feat = feat.astype(compute_dtype)

    out_c = folded["w_local_t"].shape[1]
    k_pad = folded["fc_w_t"].shape[1]
    num_classes = folded.get("num_classes", k_pad)

    tn = N if block_n is None else block_n
    assert N % tn == 0, "block_n must divide N"
    grid = (N // tn,)

    def const_spec(shape):
        # Constant weights: same block every grid step (Pallas skips re-copying
        # when the block index does not change).
        # TODO(synk): single-buffer these (pipeline_mode=pl.Buffered(1)) once
        # the installed Pallas honors it for top-level pallas_call specs; it
        # would halve the weight VMEM at production shapes.
        return pl.BlockSpec(shape, lambda n: (0,) * len(shape))

    grid_spec = pltpu.PrefetchScalarGridSpec(
        num_scalar_prefetch=0,
        grid=grid,
        in_specs=[
            pl.BlockSpec((tn, W, H, C), lambda n: (n, 0, 0, 0)),  # feat (NWHC)
            const_spec((C, out_c)),                               # folded conv w
            const_spec((1, out_c)),                               # folded conv b
            const_spec((C, k_pad)),                               # folded fc w
            const_spec((1, k_pad)),                               # folded fc b
        ],
        out_specs=[
            pl.BlockSpec((tn, C), lambda n: (n, 0)),              # global_feat
            pl.BlockSpec((tn * H, out_c), lambda n: (n, 0)),      # local (flat)
            pl.BlockSpec((tn, k_pad), lambda n: (n, 0)),          # logits (pad)
        ],
    )

    # Explicit VMEM budget: double-buffered feat block + weights + outputs with
    # headroom (exceeds the 16/32 MiB default scoped limits at production
    # shapes; clamped below physical VMEM).
    weight_bytes = sum(_nbytes(folded[k])
                       for k in ("w_local_t", "b_local", "fc_w_t", "fc_b"))
    feat_block_bytes = tn * W * H * C * jnp.dtype(feat.dtype).itemsize
    out_block_bytes = (tn * C + tn * H * out_c + tn * k_pad) * 4
    vmem_limit = int(min(
        max(2 * (feat_block_bytes + weight_bytes + out_block_bytes) + (8 << 20),
            32 << 20),
        112 << 20))

    # Advisory cost: the head is HBM-bound on feat.
    cost = pl.CostEstimate(
        flops=2 * N * (H * C * out_c + C * k_pad) + 2 * N * H * W * C,
        transcendentals=0,
        bytes_accessed=int(N * W * H * C * jnp.dtype(feat.dtype).itemsize
                           + weight_bytes
                           + (N * C + N * H * out_c + N * k_pad) * 4),
    )

    g, local_flat, logits = pl.pallas_call(
        _head_kernel,
        out_shape=(
            jax.ShapeDtypeStruct((N, C), jnp.float32),
            jax.ShapeDtypeStruct((N * H, out_c), jnp.float32),
            jax.ShapeDtypeStruct((N, k_pad), jnp.float32),
        ),
        grid_spec=grid_spec,
        compiler_params=pltpu.CompilerParams(
            dimension_semantics=("parallel",),
            vmem_limit_bytes=vmem_limit),
        cost_estimate=cost,
    )(feat, folded["w_local_t"], folded["b_local"],
      folded["fc_w_t"], folded["fc_b"])

    local = local_flat.reshape(N, H, out_c)
    if k_pad != num_classes:
        logits = logits[:, :num_classes]
    return g, local, logits


def ref_head(feat, p):
    """Pure-JAX reference of the same forward semantics (unfolded params)."""
    global_feat = feat.mean(axis=(2, 3))                                 # (N, C)
    gbn = (global_feat - p["bn1_mean"]) / jnp.sqrt(p["bn1_var"] + EPS) \
          * p["bn1_gamma"] + p["bn1_beta"]
    local = feat.mean(axis=-1)                                           # (N, C, H)
    y = jnp.einsum("oc,nch->noh", p["w_local"], local) + p["b_local"][None, :, None]
    y = (y - p["bn2_mean"][None, :, None]) \
        / jnp.sqrt(p["bn2_var"][None, :, None] + EPS) \
        * p["bn2_gamma"][None, :, None] + p["bn2_beta"][None, :, None]
    y = jnp.maximum(y, 0.0)
    local_feat = jnp.transpose(y, (0, 2, 1))                             # (N, H, out_c)
    logits = gbn @ p["fc_w"].T + p["fc_b"]
    return global_feat, local_feat, logits


if __name__ == "__main__":
    # Small, forward-consistent shapes: planes=C=128 (stand-in for densenet161's
    # 2208), local_conv_out_channels=128 (module default), num_classes=16,
    # spatial 8x8.
    N, C, H, W = 2, 128, 8, 8
    OUT_C, NUM_CLASSES = 128, 16

    key = jax.random.PRNGKey(0)
    keys = jax.random.split(key, 13)

    # Backbone output stand-in (densenet161 not re-implemented, see TODO above).
    feat = jax.random.normal(keys[0], (N, C, H, W), dtype=jnp.float32)

    raw_params = {
        # BatchNorm1d(planes)
        "bn1_gamma": 1.0 + 0.1 * jax.random.normal(keys[1], (C,), jnp.float32),
        "bn1_beta":  0.1 * jax.random.normal(keys[2], (C,), jnp.float32),
        "bn1_mean":  0.1 * jax.random.normal(keys[3], (C,), jnp.float32),
        "bn1_var":   jnp.abs(1.0 + 0.1 * jax.random.normal(keys[4], (C,), jnp.float32)),
        # Conv2d(planes, out_c, 1) weight (out_c, C, 1, 1) -> (out_c, C), bias (out_c,)
        "w_local":   0.05 * jax.random.normal(keys[5], (OUT_C, C), jnp.float32),
        "b_local":   0.05 * jax.random.normal(keys[6], (OUT_C,), jnp.float32),
        # BatchNorm2d(out_c)
        "bn2_gamma": 1.0 + 0.1 * jax.random.normal(keys[7], (OUT_C,), jnp.float32),
        "bn2_beta":  0.1 * jax.random.normal(keys[8], (OUT_C,), jnp.float32),
        "bn2_mean":  0.1 * jax.random.normal(keys[9], (OUT_C,), jnp.float32),
        "bn2_var":   jnp.abs(1.0 + 0.1 * jax.random.normal(keys[10], (OUT_C,), jnp.float32)),
        # Linear(planes, num_classes): init.normal(std=0.001), bias=0
        "fc_w":      0.001 * jax.random.normal(keys[11], (NUM_CLASSES, C), jnp.float32),
        "fc_b":      jnp.zeros((NUM_CLASSES,), jnp.float32),
    }

    g_ref, lf_ref, logits_ref = ref_head(feat, raw_params)

    # --- f32 path: bit-accurate check of the BN-folding algebra & layout. ---
    folded_f32 = fold_params(raw_params, param_dtype=jnp.float32)
    head_f32 = jax.jit(lambda f: aligned_reid_head(f, folded_f32,
                                                   compute_dtype=jnp.float32))
    g, lf, logits = head_f32(feat)
    jax.block_until_ready((g, lf, logits))
    assert g.shape == (N, C) and lf.shape == (N, H, OUT_C) \
        and logits.shape == (N, NUM_CLASSES)
    assert jnp.allclose(g, g_ref, atol=1e-4), "global_feat mismatch (f32)"
    assert jnp.allclose(lf, lf_ref, atol=1e-4), "local_feat mismatch (f32)"
    assert jnp.allclose(logits, logits_ref, atol=1e-4), "logits mismatch (f32)"

    # --- default mixed-precision path (bf16 feat/weights, f32 accumulate). ---
    folded_bf16 = fold_params(raw_params)                 # bf16 weights
    head_bf16 = jax.jit(lambda f: aligned_reid_head(f, folded_bf16))
    g2, lf2, logits2 = head_bf16(feat)
    jax.block_until_ready((g2, lf2, logits2))
    assert g2.shape == (N, C) and lf2.shape == (N, H, OUT_C) \
        and logits2.shape == (N, NUM_CLASSES)
    assert jnp.allclose(g2, g_ref, atol=3e-2, rtol=3e-2), "global_feat mismatch (bf16)"
    assert jnp.allclose(lf2, lf_ref, atol=3e-2, rtol=3e-2), "local_feat mismatch (bf16)"
    assert jnp.allclose(logits2, logits_ref, atol=3e-2, rtol=3e-2), "logits mismatch (bf16)"

    print("KERNEL_OK")
</pallas_src>

<mosaic_0001>
module attributes {stable_mosaic.version = 11 : i64} {
  func.func @_head_kernel(%arg0: i32, %arg1: memref<2x8x8x128xf32, #tpu.memory_space<vmem>>, %arg2: memref<128x128xf32, #tpu.memory_space<vmem>>, %arg3: memref<1x128xf32, #tpu.memory_space<vmem>>, %arg4: memref<128x128xf32, #tpu.memory_space<vmem>>, %arg5: memref<1x128xf32, #tpu.memory_space<vmem>>, %arg6: memref<2x128xf32, #tpu.memory_space<vmem>>, %arg7: memref<16x128xf32, #tpu.memory_space<vmem>>, %arg8: memref<2x128xf32, #tpu.memory_space<vmem>>) attributes {dimension_semantics = [#tpu.dimension_semantics<parallel>], iteration_bounds = array<i64: 1>, scalar_prefetch = 0 : i64, scratch_operands = 0 : i64, tpu.core_type = #tpu.core_type<tc>, window_params = [{transform_indices = @transform_0, window_bounds = array<i64: 2, 8, 8, 128>}, {pipeline_mode = #tpu.pipeline_mode<synchronous>, transform_indices = @transform_1, window_bounds = array<i64: 128, 128>}, {pipeline_mode = #tpu.pipeline_mode<synchronous>, transform_indices = @transform_2, window_bounds = array<i64: 1, 128>}, {pipeline_mode = #tpu.pipeline_mode<synchronous>, transform_indices = @transform_3, window_bounds = array<i64: 128, 128>}, {pipeline_mode = #tpu.pipeline_mode<synchronous>, transform_indices = @transform_4, window_bounds = array<i64: 1, 128>}, {transform_indices = @transform_5, window_bounds = array<i64: 2, 128>}, {transform_indices = @transform_6, window_bounds = array<i64: 16, 128>}, {transform_indices = @transform_7, window_bounds = array<i64: 2, 128>}]} {
    %c0 = arith.constant 0 : index
    %c0_0 = arith.constant 0 : index
    %c0_1 = arith.constant 0 : index
    %c0_2 = arith.constant 0 : index
    %0 = vector.load %arg1[%c0, %c0_0, %c0_1, %c0_2] : memref<2x8x8x128xf32, #tpu.memory_space<vmem>>, vector<2x8x8x128xf32>
    %cst = arith.constant dense<0.000000e+00> : vector<2x8x128xf32>
    %1 = vector.multi_reduction <add>, %0, %cst [1] : vector<2x8x8x128xf32> to vector<2x8x128xf32>
    %cst_3 = arith.constant 8.000000e+00 : f32
    %2 = vector.broadcast %cst_3 : f32 to vector<2x8x128xf32>
    %3 = arith.divf %1, %2 : vector<2x8x128xf32>
    %cst_4 = arith.constant dense<0.000000e+00> : vector<2x128xf32>
    %4 = vector.multi_reduction <add>, %3, %cst_4 [1] : vector<2x8x128xf32> to vector<2x128xf32>
    %cst_5 = arith.constant 8.000000e+00 : f32
    %5 = vector.broadcast %cst_5 : f32 to vector<2x128xf32>
    %6 = arith.divf %4, %5 : vector<2x128xf32>
    %c0_6 = arith.constant 0 : index
    %c0_7 = arith.constant 0 : index
    %7 = vector.load %arg6[%c0_6, %c0_7] : memref<2x128xf32, #tpu.memory_space<vmem>>, vector<2x128xf32>
    tpu.vector_store %arg6[%c0_6, %c0_7], %6 {strides = array<i32>} : memref<2x128xf32, #tpu.memory_space<vmem>>, vector<2x128xf32>,
    %c0_8 = arith.constant 0 : index
    %c0_9 = arith.constant 0 : index
    %8 = vector.load %arg2[%c0_8, %c0_9] : memref<128x128xf32, #tpu.memory_space<vmem>>, vector<128x128xf32>
    %9 = vector.shape_cast %3 : vector<2x8x128xf32> to vector<16x128xf32>
    %cst_10 = arith.constant dense<0.000000e+00> : vector<16x128xf32>
    %10 = tpu.matmul %9, %8, %cst_10 {dimension_numbers = #tpu.dot_dimension_numbers<[1], [0], [0], [1], [0, 0, 1, 1], [], []>} : vector<16x128xf32>, vector<128x128xf32>, vector<16x128xf32> -> vector<16x128xf32>
    %c0_11 = arith.constant 0 : index
    %c0_12 = arith.constant 0 : index
    %11 = vector.load %arg3[%c0_11, %c0_12] : memref<1x128xf32, #tpu.memory_space<vmem>>, vector<1x128xf32>
    %12 = vector.broadcast %11 : vector<1x128xf32> to vector<16x128xf32>
    %13 = arith.addf %10, %12 : vector<16x128xf32>
    %cst_13 = arith.constant 0.000000e+00 : f32
    %14 = vector.broadcast %cst_13 : f32 to vector<16x128xf32>
    %15 = arith.maximumf %13, %14 : vector<16x128xf32>
    %c0_14 = arith.constant 0 : index
    %c0_15 = arith.constant 0 : index
    %16 = vector.load %arg7[%c0_14, %c0_15] : memref<16x128xf32, #tpu.memory_space<vmem>>, vector<16x128xf32>
    tpu.vector_store %arg7[%c0_14, %c0_15], %15 {strides = array<i32>} : memref<16x128xf32, #tpu.memory_space<vmem>>, vector<16x128xf32>,
    %c0_16 = arith.constant 0 : index
    %c0_17 = arith.constant 0 : index
    %17 = vector.load %arg4[%c0_16, %c0_17] : memref<128x128xf32, #tpu.memory_space<vmem>>, vector<128x128xf32>
    %cst_18 = arith.constant dense<0.000000e+00> : vector<2x128xf32>
    %18 = tpu.matmul %6, %17, %cst_18 {dimension_numbers = #tpu.dot_dimension_numbers<[1], [0], [0], [1], [0, 0, 1, 1], [], []>} : vector<2x128xf32>, vector<128x128xf32>, vector<2x128xf32> -> vector<2x128xf32>
    %c0_19 = arith.constant 0 : index
    %c0_20 = arith.constant 0 : index
    %19 = vector.load %arg5[%c0_19, %c0_20] : memref<1x128xf32, #tpu.memory_space<vmem>>, vector<1x128xf32>
    %20 = vector.broadcast %19 : vector<1x128xf32> to vector<2x128xf32>
    %21 = arith.addf %18, %20 : vector<2x128xf32>
    %c0_21 = arith.constant 0 : index
    %c0_22 = arith.constant 0 : index
    %22 = vector.load %arg8[%c0_21, %c0_22] : memref<2x128xf32, #tpu.memory_space<vmem>>, vector<2x128xf32>
    tpu.vector_store %arg8[%c0_21, %c0_22], %21 {strides = array<i32>} : memref<2x128xf32, #tpu.memory_space<vmem>>, vector<2x128xf32>,
    return
  }
  func.func @transform_0(%arg0: i32) -> (i32, i32, i32, i32) {
    %c0_i32 = arith.constant 0 : i32
    %c0_i32_0 = arith.constant 0 : i32
    %c0_i32_1 = arith.constant 0 : i32
    %c0_i32_2 = arith.constant 0 : i32
    return %arg0, %c0_i32, %c0_i32_0, %c0_i32_1 : i32, i32, i32, i32
  }
  func.func @transform_1(%arg0: i32) -> (i32, i32) {
    %c0_i32 = arith.constant 0 : i32
    %c0_i32_0 = arith.constant 0 : i32
    %c0_i32_1 = arith.constant 0 : i32
    return %c0_i32, %c0_i32_0 : i32, i32
  }
  func.func @transform_2(%arg0: i32) -> (i32, i32) {
    %c0_i32 = arith.constant 0 : i32
    %c0_i32_0 = arith.constant 0 : i32
    %c0_i32_1 = arith.constant 0 : i32
    return %c0_i32, %c0_i32_0 : i32, i32
  }
  func.func @transform_3(%arg0: i32) -> (i32, i32) {
    %c0_i32 = arith.constant 0 : i32
    %c0_i32_0 = arith.constant 0 : i32
    %c0_i32_1 = arith.constant 0 : i32
    return %c0_i32, %c0_i32_0 : i32, i32
  }
  func.func @transform_4(%arg0: i32) -> (i32, i32) {
    %c0_i32 = arith.constant 0 : i32
    %c0_i32_0 = arith.constant 0 : i32
    %c0_i32_1 = arith.constant 0 : i32
    return %c0_i32, %c0_i32_0 : i32, i32
  }
  func.func @transform_5(%arg0: i32) -> (i32, i32) {
    %c0_i32 = arith.constant 0 : i32
    %c0_i32_0 = arith.constant 0 : i32
    return %arg0, %c0_i32 : i32, i32
  }
  func.func @transform_6(%arg0: i32) -> (i32, i32) {
    %c0_i32 = arith.constant 0 : i32
    %c0_i32_0 = arith.constant 0 : i32
    return %arg0, %c0_i32 : i32, i32
  }
  func.func @transform_7(%arg0: i32) -> (i32, i32) {
    %c0_i32 = arith.constant 0 : i32
    %c0_i32_0 = arith.constant 0 : i32
    return %arg0, %c0_i32 : i32, i32
  }
}

</mosaic_0001>

<bundles_post_ra>
// kernel: _lambda_.1
= control target key start
LH: loop header
LB: loop body
LE: loop exit
PB: predicated region body
PF: predicated region fallthrough
CT: control target
= control target key end

     0   :  { %13 = vsyncpa [#allocation3], 0  ;;  %v558_v4 = vmov 0.0|0.0   ;;  %vm559_vm0 = vmmov 0   ;;  %v560_v8 = vmov 0.0   ;;  %s800_s0 = inlined_call_operand.vmem [shape: f32[2,8,8,128], index: 0, kind: input, shape index: {}]   ;;  %s801_s1 = inlined_call_operand.vmem [shape: f32[128,128], index: 1, kind: input, shape index: {}]   ;;  %s802_s2 = inlined_call_operand.vmem [shape: f32[1,128], index: 2, kind: input, shape index: {}]   ;;  %s803_s3 = inlined_call_operand.vmem [shape: f32[128,128], index: 3, kind: input, shape index: {}]   ;;  %s804_s4 = inlined_call_operand.vmem [shape: f32[1,128], index: 4, kind: input, shape index: {}]   ;;  %s805_s5 = inlined_call_operand.hbm [shape: f32[2,128], index: 5, kind: output, shape index: {0}]   ;;  %s806_s6 = inlined_call_operand.hbm [shape: f32[16,128], index: 6, kind: output, shape index: {1}]   ;;  %s807_s7 = inlined_call_operand.hbm [shape: f32[2,128], index: 7, kind: output, shape index: {2}]  }
   0x1   :  { %v78_v0 = vld [vmem:[%s801_s1] sm:$0xff]  ;;  %v79_v1 = vld [vmem:[%s801_s1 + $0x8] sm:$0xff]  ;;  %v80_v2 = vld [vmem:[%s801_s1 + $0x10] sm:$0xff]  ;;  %456 = vmatprep.subr.bf16.mxu1 %v558_v4  ;;  %421 = vmatprep.mubr.msk.f32.mxu1 %vm559_vm0, %v560_v8 }
   0x2   :  { %v424_v3 = vpack.c.bf16 %v79_v1, %v78_v0  ;;  %v81_v5 = vld [vmem:[%s801_s1 + $0x18] sm:$0xff]  ;;  %v180_v6 = vld [vmem:[%s803_s3] sm:$0xff]  ;;  %v181_v7 = vld [vmem:[%s803_s3 + $0x8] sm:$0xff] }
   0x3   :  { %v428_v9 = vpack.c.bf16 %v81_v5, %v80_v2  ;;  %v457_v10 = vpack.c.bf16 %v181_v7, %v180_v6  ;;  %v82_v11 = vld [vmem:[%s801_s1 + $0x20] sm:$0xff]  ;;  %v83_v12 = vld [vmem:[%s801_s1 + $0x28] sm:$0xff]  ;;  %v182_v13 = vld [vmem:[%s803_s3 + $0x10] sm:$0xff] }
   0x4   :  { %425 = vmatprep.subr.bf16.mxu0 %v424_v3  ;;  %v183_v14 = vld [vmem:[%s803_s3 + $0x18] sm:$0xff]  ;;  %v432_v16 = vpack.c.bf16 %v83_v12, %v82_v11  ;;  %v184_v17 = vld [vmem:[%s803_s3 + $0x20] sm:$0xff]  ;;  %v185_v18 = vld [vmem:[%s803_s3 + $0x28] sm:$0xff] }
   0x5   :  { %427 = vmatpush3.bf16.msra.mxu0 %v424_v3  ;;  %458 = vmatpush3.bf16.msra.mxu1 %v457_v10  ;;  %v460_v15 = vpack.c.bf16 %v183_v14, %v182_v13  ;;  %v84_v19 = vld [vmem:[%s801_s1 + $0x30] sm:$0xff]  ;;  %v85_v20 = vld [vmem:[%s801_s1 + $0x38] sm:$0xff]  ;;  %v463_v21 = vpack.c.bf16 %v185_v18, %v184_v17  ;;  %v86_v22 = vld [vmem:[%s801_s1 + $0x40] sm:$0xff] }
   0x6   :  { %429 = vmatprep.subr.bf16.mxu0 %v428_v9  ;;  %459 = vmatprep.subr.bf16.mxu1 %v558_v4  ;;  %v436_v23 = vpack.c.bf16 %v85_v20, %v84_v19  ;;  %v87_v24 = vld [vmem:[%s801_s1 + $0x48] sm:$0xff]  ;;  %v186_v25 = vld [vmem:[%s803_s3 + $0x30] sm:$0xff]  ;;  %v187_v26 = vld [vmem:[%s803_s3 + $0x38] sm:$0xff] }
   0x7   :  { %v25_v27 = vld [vmem:[%s800_s0] sm:$0xff]  ;;  %v26_v28 = vld [vmem:[%s800_s0 + $0x8] sm:$0xff]  ;;  %v27_v29 = vld [vmem:[%s800_s0 + $0x10] sm:$0xff]  ;;  %v466_v31 = vpack.c.bf16 %v187_v26, %v186_v25  ;;  %v440_v35 = vpack.c.bf16 %v87_v24, %v86_v22 }
   0x8   :  { %v41_v30 = vadd.f32 %v26_v28, %v25_v27  ;;  %v188_v32 = vld [vmem:[%s803_s3 + $0x40] sm:$0xff]  ;;  %v28_v33 = vld [vmem:[%s800_s0 + $0x18] sm:$0xff]  ;;  %v189_v36 = vld [vmem:[%s803_s3 + $0x48] sm:$0xff] }
   0x9   :  { %431 = vmatpush3.bf16.msra.mxu0 %v428_v9  ;;  %461 = vmatpush3.bf16.msra.mxu1 %v460_v15  ;;  %v33_v34 = vld [vmem:[%s800_s0 + $0x40] sm:$0xff]  ;;  %v34_v38 = vld [vmem:[%s800_s0 + $0x48] sm:$0xff]  ;;  %v35_v39 = vld [vmem:[%s800_s0 + $0x50] sm:$0xff]  ;;  %v469_v46 = vpack.c.bf16 %v189_v36, %v188_v32 }
   0xa   :  { %433 = vmatprep.subr.bf16.mxu0 %v432_v16  ;;  %462 = vmatprep.subr.bf16.mxu1 %v558_v4  ;;  %v42_v37 = vadd.f32 %v41_v30, %v27_v29  ;;  %v88_v40 = vld [vmem:[%s801_s1 + $0x50] sm:$0xff]  ;;  %v89_v41 = vld [vmem:[%s801_s1 + $0x58] sm:$0xff]  ;;  %v29_v42 = vld [vmem:[%s800_s0 + $0x20] sm:$0xff]  ;;  %v48_v43 = vadd.f32 %v34_v38, %v33_v34 }
   0xb   :  { %v36_v45 = vld [vmem:[%s800_s0 + $0x58] sm:$0xff]  ;;  %v30_v47 = vld [vmem:[%s800_s0 + $0x28] sm:$0xff] }
   0xc   :  { %v43_v44 = vadd.f32 %v42_v37, %v28_v33  ;;  %v49_v48 = vadd.f32 %v48_v43, %v35_v39 }
   0xd   :  { %435 = vmatpush3.bf16.msra.mxu0 %v432_v16  ;;  %464 = vmatpush3.bf16.msra.mxu1 %v463_v21 }
   0xe   :  { %437 = vmatprep.subr.bf16.mxu0 %v436_v23  ;;  %465 = vmatprep.subr.bf16.mxu1 %v558_v4 }
  0x11   :  { %439 = vmatpush3.bf16.msra.mxu0 %v436_v23  ;;  %467 = vmatpush3.bf16.msra.mxu1 %v466_v31 }
  0x12   :  { %14 = vsyncpa [#allocation5], 0  ;;  %441 = vmatprep.subr.bf16.mxu0 %v440_v35  ;;  %468 = vmatprep.subr.bf16.mxu1 %v558_v4  ;;  %v444_v49 = vpack.c.bf16 %v89_v41, %v88_v40  ;;  %v190_v50 = vld [vmem:[%s803_s3 + $0x50] sm:$0xff]  ;;  %v191_v51 = vld [vmem:[%s803_s3 + $0x58] sm:$0xff]  ;;  %v44_v52 = vadd.f32 %v43_v44, %v29_v42  ;;  %v50_v57 = vadd.f32 %v49_v48, %v36_v45  ;;  %vm74_vm1 = vcmask 1041409  }
  0x13   :  { %v37_v53 = vld [vmem:[%s800_s0 + $0x60] sm:$0xff]  ;;  %v91_v55 = vld [vmem:[%s801_s1 + $0x68] sm:$0xff]  ;;  %v31_v56 = vld [vmem:[%s800_s0 + $0x30] sm:$0xff]  ;;  %v472_v60 = vpack.c.bf16 %v191_v51, %v190_v50 }
  0x14   :  { %v90_v54 = vld [vmem:[%s801_s1 + $0x60] sm:$0xff]  ;;  %v45_v58 = vadd.f32 %v44_v52, %v30_v47  ;;  %v38_v59 = vld [vmem:[%s800_s0 + $0x68] sm:$0xff]  ;;  %v32_v61 = vld [vmem:[%s800_s0 + $0x38] sm:$0xff]  ;;  %v51_v62 = vadd.f32 %v50_v57, %v37_v53 }
  0x15   :  { %443 = vmatpush3.bf16.msra.mxu0 %v440_v35  ;;  %470 = vmatpush3.bf16.msra.mxu1 %v469_v46  ;;  %v448_v63 = vpack.c.bf16 %v91_v55, %v90_v54  ;;  %v192_v0 = vld [vmem:[%s803_s3 + $0x60] sm:$0xff]  ;;  %v193_v1 = vld [vmem:[%s803_s3 + $0x68] sm:$0xff]  ;;  %v39_v3 = vld [vmem:[%s800_s0 + $0x70] sm:$0xff] }
  0x16   :  { %445 = vmatprep.subr.bf16.mxu0 %v444_v49  ;;  %471 = vmatprep.subr.bf16.mxu1 %v558_v4  ;;  %v46_v2 = vadd.f32 %v45_v58, %v31_v56  ;;  %v92_v5 = vld [vmem:[%s801_s1 + $0x70] sm:$0xff]  ;;  %v93_v6 = vld [vmem:[%s801_s1 + $0x78] sm:$0xff]  ;;  %v52_v7 = vadd.f32 %v51_v62, %v38_v59  ;;  %v475_v10 = vpack.c.bf16 %v193_v1, %v192_v0 }
  0x17   :  { %v40_v9 = vld [vmem:[%s800_s0 + $0x78] sm:$0xff]  ;;  %v452_v12 = vpack.c.bf16 %v93_v6, %v92_v5  ;;  %v194_v14 = vld [vmem:[%s803_s3 + $0x70] sm:$0xff]  ;;  %s561_s0 = smov [#allocation2]  }
  0x18   :  { %v47_v8 = vadd.f32 %v46_v2, %v32_v61  ;;  %v53_v11 = vadd.f32 %v52_v7, %v39_v3  ;;  %v195_v15 = vld [vmem:[%s803_s3 + $0x78] sm:$0xff]  ;;  %s280_s3 = sshll.u32 %s561_s0, 4  ;;  %s281_s3 = int_to_ptr.vmem [resolvable:$true] %s280_s3 }
  0x19   :  { %447 = vmatpush3.bf16.msra.mxu0 %v444_v49  ;;  %473 = vmatpush3.bf16.msra.mxu1 %v472_v60  ;;  %v478_v19 = vpack.c.bf16 %v195_v15, %v194_v14  ;;  %s488_s27 = scalar_lea.vmem %s281_s3, 32  ;;  %p493_p1 = scmp.lt.s32.totalorder %s281_s3, %s281_s3 }
  0x1a   :  { %449 = vmatprep.subr.bf16.mxu0 %v448_v63  ;;  %474 = vmatprep.subr.bf16.mxu1 %v558_v4  ;;  %v56_v13 = vmul.f32 0.125, %v47_v8  ;;  %v54_v16 = vadd.f32 %v53_v11, %v40_v9  ;;  %p489_p0 = scmp.ne.s32.totalorder %s281_s3, %s488_s27  ;;  %p494_p2 = scmp.lt.s32.totalorder %s488_s27, %s488_s27 }
  0x1c   :  { %v58_v17 = vrot.slane %v56_v13, 4  ;;  %386 = vmatprep.mubr.f32.mxu0 %v56_v13  ;;  %v57_v18 = vmul.f32 0.125, %v54_v16  ;;  %p495_p3 = por %p494_p2, %p493_p1 }
  0x1d   :  { %451 = vmatpush3.bf16.msra.mxu0 %v448_v63  ;;  %476 = vmatpush3.bf16.msra.mxu1 %v475_v10 }
  0x1e   :  { %453 = vmatprep.subr.bf16.mxu0 %v452_v12  ;;  %v59_v20 = vadd.f32 %v58_v17, %v56_v13  ;;  %477 = vmatprep.subr.bf16.mxu1 %v558_v4  ;;  %v64_v21 = vrot.slane %v57_v18, 4  ;;  %p496_p4 = pnand %p495_p3, %p489_p0 }
  0x20   :  { %v60_v22 = vrot.slane %v59_v20, 2  ;;  %v65_v23 = vadd.f32 %v64_v21, %v57_v18 }
  0x21   :  { %455 = vmatpush3.bf16.msra.mxu0 %v452_v12  ;;  %479 = vmatpush3.bf16.msra.mxu1 %v478_v19 }
  0x22   :  { %v61_v24 = vadd.f32 %v60_v22, %v59_v20  ;;  %v66_v25 = vrot.slane %v65_v23, 2 }
  0x24   :  { %387 = vmatmul.mubr.f32.vlgmr.msra.gmra.mrb[0].mxu0 %v57_v18  ;;  %v62_v26 = vrot.slane %v61_v24, 1  ;;  %v67_v27 = vadd.f32 %v66_v25, %v65_v23 }
  0x26   :  { %v63_v28 = vadd.f32 %v62_v26, %v61_v24  ;;  %v68_v29 = vrot.slane %v67_v27, 1 }
  0x28   :  { %v69_v30 = vadd.f32 %v68_v29, %v67_v27  ;;  %v70_v31 = vmul.f32 0.125, %v63_v28 }
  0x2a   :  { %v71_v32 = vmul.f32 0.125, %v69_v30 }
  0x2c   :  { %v75_v33 = vsel %vm74_vm1, %v71_v32, %v70_v31 }
  0x2d   :  { %422 = vmatmul.mubr.f32.vlgmr.msra.gmra.mrb[0].mxu1 %v75_v33  ;;  %77 = vst [vmem:[#allocation2] sm:$0x3] %v75_v33 }
  0x2e   :  { %499 = shalt.err (!%p496_p4)
}
  0x2f   :  { %s500_s30 = scalar_lea.hbm %s805_s5, 32 }
  0x30   :  { %p501_p5 = scmp.ne.s32.totalorder %s805_s5, %s500_s30  ;;  %p504_p6 = scmp.lt.u32.totalorder %s500_s30, %s805_s5 }
  0x32   :  { %p506_p7 = pnand %p504_p6, %p501_p5 }
  0x34   :  { %509 = shalt.err (!%p506_p7)
}
  0x35   :  { %283 = dma.vmem_to_hbm [thread:$0]  %s281_s3, 32, %s805_s5, [#allocation3]   ;;  %v317_v4 = vld [vmem:[%s802_s2] ss:$0 sm:$0xff] }
  0x36   :  { %s562_s16 = smov [#allocation4]  }
  0x37   :  { %s289_s17 = sshll.u32 %s562_s16, 4  ;;  %s290_s17 = int_to_ptr.vmem [resolvable:$true] %s289_s17 }
  0x38   :  { %s510_s18 = scalar_lea.vmem %s290_s17, 256  ;;  %p515_p9 = scmp.lt.s32.totalorder %s290_s17, %s290_s17 }
  0x39   :  { %p511_p8 = scmp.ne.s32.totalorder %s290_s17, %s510_s18  ;;  %p516_p10 = scmp.lt.s32.totalorder %s510_s18, %s510_s18 }
  0x3b   :  { %p517_p11 = por %p516_p10, %p515_p9 }
  0x3d   :  { %p518_p12 = pnand %p517_p11, %p511_p8 }
  0xf7   :  { %v388_v34 = vpop.f32.mrb[0].mxu0 }
  0xf8   :  { %v173_v35 = vadd.f32 %v388_v34, %v317_v4  ;;  %v167_v36 = vpop.f32.mrb[1].mxu0 }
  0xf9   :  { %v168_v37 = vadd.f32 %v317_v4, %v167_v36 }
  0xfa   :  { %v177_v38 = vmax.f32 %v173_v35, 0.0 }
  0xfb   :  { %v176_v39 = vmax.f32 %v168_v37, 0.0 }
  0xfc   :  { %179 = vst [vmem:[#allocation4 + $0x8] sm:$0xff] %v177_v38 }
  0xfd   :  { %178 = vst [vmem:[#allocation4] sm:$0xff] %v176_v39 }
  0xfe   :  { %521 = shalt.err (!%p518_p12)
}
  0xff   :  { %s522_s19 = scalar_lea.hbm %s806_s6, 256 }
 0x100   :  { %p523_p13 = scmp.ne.s32.totalorder %s806_s6, %s522_s19  ;;  %p526_p0 = scmp.lt.u32.totalorder %s522_s19, %s806_s6 }
 0x102   :  { %p528_p1 = pnand %p526_p0, %p523_p13 }
 0x104   :  { %531 = shalt.err (!%p528_p1)
}
 0x105   :  { %s563_s24 = smov 128   ;;  %s564_s25 = smov 8   ;;  %v318_v40 = vld [vmem:[%s804_s4] ss:$0 sm:$0xff]  ;;  %v269_v41 = vpop.f32.mrb[0].mxu1 }
 0x106   :  { %295 = dma.vmem_to_hbm [thread:$0]  %s290_s17, 256, %s806_s6, [#allocation5], %s563_s24, %s563_s24, %s564_s25   ;;  %v270_v42 = vadd.f32 %v318_v40, %v269_v41  ;;  %v423_v43 = vpop.f32.mrb[1].mxu1 }
 0x107   :  { %s565_s27 = smov [#allocation6]  }
 0x108   :  { %s302_s28 = sshll.u32 %s565_s27, 4  ;;  %273 = vst [vmem:[#allocation6] sm:$0x3] %v270_v42  ;;  %s303_s28 = int_to_ptr.vmem [resolvable:$true] %s302_s28 }
 0x109   :  { %s532_s29 = scalar_lea.vmem %s303_s28, 32  ;;  %p537_p3 = scmp.lt.s32.totalorder %s303_s28, %s303_s28 }
 0x10a   :  { %p533_p2 = scmp.ne.s32.totalorder %s303_s28, %s532_s29  ;;  %p538_p4 = scmp.lt.s32.totalorder %s532_s29, %s532_s29 }
 0x10c   :  { %p539_p5 = por %p538_p4, %p537_p3 }
 0x10e   :  { %p540_p6 = pnand %p539_p5, %p533_p2 }
 0x110   :  { %543 = shalt.err (!%p540_p6)
}
 0x111   :  { %s544_s8 = scalar_lea.hbm %s807_s7, 32 }
 0x112   :  { %p545_p7 = scmp.ne.s32.totalorder %s807_s7, %s544_s8  ;;  %p548_p8 = scmp.lt.u32.totalorder %s544_s8, %s807_s7 }
 0x114   :  { %p550_p9 = pnand %p548_p8, %p545_p7 }
 0x116   :  { %553 = shalt.err (!%p550_p9)
}
 0x117   :  { %305 = dma.vmem_to_hbm [thread:$0]  %s303_s28, 32, %s807_s7, [#allocation5]  }
 0x118   :  { %554 = dma.done.wait [#allocation3], 32  }
 0x119   :  { %555 = vsyncadd [#allocation3], 4294967264 }
 0x11a   :  { %556 = dma.done.wait [#allocation5], 288  }
 0x11b   :  { %557 = vsyncadd [#allocation5], 4294967008 }
 0x11c   :  { %315 = vsyncpa [#allocation3], 1 }
 0x11d   :  { %316 = vsyncpa [#allocation5], 1 }

</bundles_post_ra>
